<compile_context>
chip_gen: v5e
topology: v5e:2x2
jax: 0.10.0
libtpu: 0.0.40
codegen_flags: <defaults>
</compile_context>

<pallas_src>
import functools

import jax
import jax.numpy as jnp
from jax.experimental import pallas as pl
from jax.experimental.pallas import tpu as pltpu


def _distance_loss_kernel(w_ref, d2_ref, tgt_ref, pred_ref, out_ref, sm_ref,
                          *, num_classes):
    c = pl.program_id(1)                               # class index (sequential)

    tgt = tgt_ref[0]                                   # (1, Pp) int32

    # ---- per-image softmax, hoisted out of the class loop (runs at c == 0) ----
    @pl.when(c == 0)
    def _():
        logits = pred_ref[0]                           # (C, Pp) f32
        mx = jnp.max(logits, axis=0, keepdims=True)
        ex = jnp.exp(logits - mx)
        sm = ex / jnp.sum(ex, axis=0, keepdims=True)
        valid = (tgt < num_classes).astype(jnp.float32)   # 0 at padded pixels
        sm_ref[...] = sm * valid

    sm_c = sm_ref[pl.ds(c, 1), :]                      # (1, Pp) softmax of class c

    # ---- brute-force EDT for class c: additive lane mask + lane-axis min ----
    big = jnp.float32(1e30)
    mask_row = jnp.where(tgt == c, jnp.float32(0.0), big)     # (1, Pp)
    d2m = d2_ref[...] + mask_row                               # add + ...
    dist = jnp.sqrt(jnp.min(d2m, axis=-1, keepdims=True))      # ... min -> (Pp, 1)
    dmax = jnp.max(dist)                                       # max BEFORE overwrite

    # ---- weighted contribution of this (n, c) map ----
    # sum_p sm_c * dist_raw  via a (1,Pp)@(Pp,1) MXU dot (no relayout needed)
    sdist = jnp.dot(sm_c, dist, preferred_element_type=jnp.float32)   # (1, 1)
    # softmax mass on class-c pixels (they get overwritten with -dmax)
    cmass = jnp.sum(jnp.where(tgt == c, sm_c, jnp.float32(0.0)))

    out_ref[...] = ((sdist - dmax * cmass) * w_ref[c]).reshape(1, 1, 1, 1)


def distance_loss_pallas(predictions, targets, weight=None,
                         reduction="elementwise_mean"):
    nb, nc, h, width = predictions.shape
    p = h * width
    pp = ((p + 127) // 128) * 128                      # lane-dense padded P
    pad = pp - p

    if weight is None or len(weight) != nc:
        weight_arr = jnp.ones((nc,), jnp.float32)
    else:
        weight_arr = jnp.asarray(weight, jnp.float32)
    w_norm = (weight_arr / jnp.sum(weight_arr)).astype(jnp.float32)

    preds = predictions.astype(jnp.float32).reshape(nb, nc, p)
    tgts = targets.astype(jnp.int32).reshape(nb, 1, p)
    if pad:
        preds = jnp.pad(preds, ((0, 0), (0, 0), (0, pad)))
        tgts = jnp.pad(tgts, ((0, 0), (0, 0), (0, pad)), constant_values=nc)

    # Host-precomputed squared-distance geometry (O(P) coord vectors, one outer
    # product); resident in VMEM for the whole grid via a constant index_map.
    idx = jnp.arange(p, dtype=jnp.int32)
    yy = (idx // width).astype(jnp.float32)
    xx = (idx % width).astype(jnp.float32)
    yy = jnp.pad(yy, (0, pad))                         # padded px -> coord (0,0)
    xx = jnp.pad(xx, (0, pad))
    dy = yy[:, None] - yy[None, :]
    dx = xx[:, None] - xx[None, :]
    d2 = dy * dy + dx * dx                             # (Pp, Pp) f32

    kernel = functools.partial(_distance_loss_kernel, num_classes=nc)

    grid_spec = pltpu.PrefetchScalarGridSpec(
        num_scalar_prefetch=0,
        grid=(nb, nc),
        in_specs=[
            pl.BlockSpec(memory_space=pltpu.MemorySpace.SMEM),      # w_norm (C,)
            pl.BlockSpec((pp, pp), lambda n, c: (0, 0)),            # d2, resident
            pl.BlockSpec((1, 1, pp), lambda n, c: (n, 0, 0)),       # targets row
            pl.BlockSpec((1, nc, pp), lambda n, c: (n, 0, 0)),      # logits / image
        ],
        out_specs=pl.BlockSpec((1, 1, 1, 1), lambda n, c: (n, c, 0, 0)),
        scratch_shapes=[pltpu.VMEM((nc, pp), jnp.float32)],         # softmax / image
    )

    # Size the scoped VMEM to the actual footprint (double-buffered inputs +
    # scratch) with headroom, capped so it stays safe on every generation.
    vmem_needed = 4 * (2 * pp * pp + 2 * nc * pp + 2 * pp + nc * pp + 2 * 8 * 128)
    vmem_limit = int(min(48 * 1024 * 1024, 2 * vmem_needed + 8 * 1024 * 1024))

    partials = pl.pallas_call(
        kernel,
        out_shape=jax.ShapeDtypeStruct((nb, nc, 1, 1), jnp.float32),
        grid_spec=grid_spec,
        compiler_params=pltpu.CompilerParams(
            dimension_semantics=("parallel", "arbitrary"),
            vmem_limit_bytes=vmem_limit),
    )(w_norm, d2, tgts, preds)

    if reduction != "elementwise_mean":
        raise NotImplementedError(reduction)           # TODO(synk): 'sum'/'none'
    return jnp.sum(partials) / (nb * nc * p)           # mean over N*C*H*W


def distance_loss_ref(predictions, targets, weight):
    """Pure-JAX reference with identical math (used only to verify the kernel)."""
    nb, nc, h, w = predictions.shape
    sm = jax.nn.softmax(predictions.astype(jnp.float32), axis=1)
    yy, xx = jnp.meshgrid(jnp.arange(h), jnp.arange(w), indexing="ij")
    coords = jnp.stack([yy.ravel(), xx.ravel()], -1).astype(jnp.float32)   # (P, 2)
    d2 = jnp.sum((coords[:, None, :] - coords[None, :, :]) ** 2, -1)       # (P, P)
    onehot = targets[:, None, :, :] == jnp.arange(nc)[None, :, None, None]  # (N,C,H,W)
    mask = onehot.reshape(nb, nc, h * w)
    d2m = jnp.where(mask[:, :, :, None], d2[None, None, :, :], jnp.inf)
    dist = jnp.sqrt(jnp.min(d2m, axis=2)).reshape(nb, nc, h, w)
    dmax = jnp.max(dist, axis=(2, 3), keepdims=True)
    dist = jnp.where(onehot, -dmax, dist)
    wm = weight[None, :, None, None]
    loss = sm * dist * wm / jnp.sum(weight)
    return jnp.mean(loss)


if __name__ == "__main__":
    N, C, H, W = 2, 4, 16, 16
    key = jax.random.PRNGKey(0)
    k1, k2 = jax.random.split(key)

    predictions = jax.random.normal(k1, (N, C, H, W), jnp.float32)
    targets = jax.random.randint(k2, (N, H, W), 0, C, jnp.int32)
    # guarantee every class is present in every image (well-defined EDT regime)
    targets = targets.at[:, 0, :C].set(jnp.arange(C, dtype=jnp.int32))

    weight = [1.0, 2.0, 0.5, 1.5]   # deterministic "buffer" from __init__(weight=...)

    loss = distance_loss_pallas(predictions, targets, weight=weight)
    loss = jax.block_until_ready(loss)

    ref = distance_loss_ref(predictions, targets, jnp.asarray(weight, jnp.float32))
    assert jnp.allclose(loss, ref, rtol=1e-4, atol=1e-5), (loss, ref)

    print("KERNEL_OK")
</pallas_src>

<mosaic_0001>
module attributes {stable_mosaic.version = 11 : i64} {
  func.func @_distance_loss_kernel(%arg0: i32, %arg1: i32, %arg2: memref<4xf32, #tpu.memory_space<smem>>, %arg3: memref<256x256xf32, #tpu.memory_space<vmem>>, %arg4: memref<1x1x256xi32, #tpu.memory_space<vmem>>, %arg5: memref<1x4x256xf32, #tpu.memory_space<vmem>>, %arg6: memref<1x1x1x1xf32, #tpu.memory_space<vmem>>, %arg7: memref<4x256xf32, #tpu.memory_space<vmem>>) attributes {dimension_semantics = [#tpu.dimension_semantics<parallel>, #tpu.dimension_semantics<arbitrary>], iteration_bounds = array<i64: 2, 4>, scalar_prefetch = 0 : i64, scratch_operands = 1 : i64, tpu.core_type = #tpu.core_type<tc>, window_params = [{transform_indices = @transform_0, window_bounds = array<i64: 4>}, {pipeline_mode = #tpu.pipeline_mode<synchronous>, transform_indices = @transform_1, window_bounds = array<i64: 256, 256>}, {transform_indices = @transform_2, window_bounds = array<i64: 1, 1, 256>}, {transform_indices = @transform_3, window_bounds = array<i64: 1, 4, 256>}, {transform_indices = @transform_4, window_bounds = array<i64: 1, 1, 1, 1>}]} {
    %c0 = arith.constant 0 : index
    %c0_0 = arith.constant 0 : index
    %c0_1 = arith.constant 0 : index
    %0 = vector.load %arg4[%c0, %c0_0, %c0_1] : memref<1x1x256xi32, #tpu.memory_space<vmem>>, vector<1x1x256xi32>
    %1 = vector.shape_cast %0 : vector<1x1x256xi32> to vector<1x256xi32>
    %c0_i32 = arith.constant 0 : i32
    %2 = arith.cmpi eq, %arg1, %c0_i32 : i32
    %3 = arith.extui %2 : i1 to i32
    %c0_i32_2 = arith.constant 0 : i32
    %4 = arith.cmpi ne, %3, %c0_i32_2 : i32
    scf.if %4 {
      %c0_16 = arith.constant 0 : index
      %c0_17 = arith.constant 0 : index
      %c0_18 = arith.constant 0 : index
      %40 = vector.load %arg5[%c0_16, %c0_17, %c0_18] : memref<1x4x256xf32, #tpu.memory_space<vmem>>, vector<1x4x256xf32>
      %41 = vector.shape_cast %40 : vector<1x4x256xf32> to vector<4x256xf32>
      %cst_19 = arith.constant dense<0xFF800000> : vector<256xf32>
      %42 = vector.multi_reduction <maximumf>, %41, %cst_19 [0] : vector<4x256xf32> to vector<256xf32>
      %43 = vector.shape_cast %42 : vector<256xf32> to vector<1x256xf32>
      %44 = vector.broadcast %43 : vector<1x256xf32> to vector<4x256xf32>
      %45 = arith.subf %41, %44 : vector<4x256xf32>
      %46 = math.exp %45 : vector<4x256xf32>
      %cst_20 = arith.constant dense<0.000000e+00> : vector<256xf32>
      %47 = vector.multi_reduction <add>, %46, %cst_20 [0] : vector<4x256xf32> to vector<256xf32>
      %48 = vector.shape_cast %47 : vector<256xf32> to vector<1x256xf32>
      %49 = vector.broadcast %48 : vector<1x256xf32> to vector<4x256xf32>
      %50 = arith.divf %46, %49 : vector<4x256xf32>
      %c4_i32 = arith.constant 4 : i32
      %51 = vector.broadcast %c4_i32 : i32 to vector<1x256xi32>
      %52 = arith.cmpi slt, %1, %51 : vector<1x256xi32>
      %53 = arith.extui %52 : vector<1x256xi1> to vector<1x256xi32>
      %54 = arith.sitofp %53 : vector<1x256xi32> to vector<1x256xf32>
      %55 = vector.broadcast %54 : vector<1x256xf32> to vector<4x256xf32>
      %56 = arith.mulf %50, %55 : vector<4x256xf32>
      %c0_21 = arith.constant 0 : index
      %c0_22 = arith.constant 0 : index
      %57 = vector.load %arg7[%c0_21, %c0_22] : memref<4x256xf32, #tpu.memory_space<vmem>>, vector<4x256xf32>
      tpu.vector_store %arg7[%c0_21, %c0_22], %56 {strides = array<i32>} : memref<4x256xf32, #tpu.memory_space<vmem>>, vector<4x256xf32>,
    } else {
    }
    %5 = arith.index_cast %arg1 : i32 to index
    %c0_3 = arith.constant 0 : index
    %6 = vector.load %arg7[%5, %c0_3] : memref<4x256xf32, #tpu.memory_space<vmem>>, vector<1x256xf32>
    %7 = vector.broadcast %arg1 : i32 to vector<1x256xi32>
    %8 = arith.cmpi eq, %1, %7 : vector<1x256xi32>
    %cst = arith.constant 0.000000e+00 : f32
    %cst_4 = arith.constant 1.000000e+30 : f32
    %9 = vector.broadcast %cst : f32 to vector<1x256xf32>
    %10 = vector.broadcast %cst_4 : f32 to vector<1x256xf32>
    %11 = arith.select %8, %9, %10 : vector<1x256xi1>, vector<1x256xf32>
    %c0_5 = arith.constant 0 : index
    %c0_6 = arith.constant 0 : index
    %12 = vector.load %arg3[%c0_5, %c0_6] : memref<256x256xf32, #tpu.memory_space<vmem>>, vector<256x256xf32>
    %13 = vector.broadcast %11 : vector<1x256xf32> to vector<256x256xf32>
    %14 = arith.addf %12, %13 : vector<256x256xf32>
    %cst_7 = arith.constant dense<0x7F800000> : vector<256xf32>
    %15 = vector.multi_reduction <minimumf>, %14, %cst_7 [1] : vector<256x256xf32> to vector<256xf32>
    %16 = vector.shape_cast %15 : vector<256xf32> to vector<256x1xf32>
    %17 = math.sqrt %16 : vector<256x1xf32>
    %18 = vector.shape_cast %17 : vector<256x1xf32> to vector<1x256x1xf32>
    %cst_8 = arith.constant dense<0xFF800000> : vector<1xf32>
    %19 = vector.multi_reduction <maximumf>, %18, %cst_8 [1, 2] : vector<1x256x1xf32> to vector<1xf32>
    %20 = vector.shape_cast %19 : vector<1xf32> to vector<1x1x1xf32>
    %21 = vector.extract %20[0, 0, 0] : f32 from vector<1x1x1xf32>
    %cst_9 = arith.constant dense<0.000000e+00> : vector<1x1xf32>
    %22 = tpu.matmul %6, %17, %cst_9 {dimension_numbers = #tpu.dot_dimension_numbers<[1], [0], [0], [1], [0, 0, 1, 1], [], []>} : vector<1x256xf32>, vector<256x1xf32>, vector<1x1xf32> -> vector<1x1xf32>
    %23 = vector.broadcast %arg1 : i32 to vector<1x256xi32>
    %24 = arith.cmpi eq, %1, %23 : vector<1x256xi32>
    %cst_10 = arith.constant 0.000000e+00 : f32
    %25 = vector.broadcast %cst_10 : f32 to vector<1x256xf32>
    %26 = arith.select %24, %6, %25 : vector<1x256xi1>, vector<1x256xf32>
    %27 = vector.shape_cast %26 : vector<1x256xf32> to vector<1x1x256xf32>
    %cst_11 = arith.constant dense<0.000000e+00> : vector<1xf32>
    %28 = vector.multi_reduction <add>, %27, %cst_11 [1, 2] : vector<1x1x256xf32> to vector<1xf32>
    %29 = vector.shape_cast %28 : vector<1xf32> to vector<1x1x1xf32>
    %30 = vector.extract %29[0, 0, 0] : f32 from vector<1x1x1xf32>
    %31 = arith.mulf %21, %30 : f32
    %32 = vector.broadcast %31 : f32 to vector<1x1xf32>
    %33 = arith.subf %22, %32 : vector<1x1xf32>
    %34 = arith.index_cast %arg1 : i32 to index
    %35 = memref.load %arg2[%34] : memref<4xf32, #tpu.memory_space<smem>>
    %36 = vector.broadcast %35 : f32 to vector<1x1xf32>
    %37 = arith.mulf %33, %36 : vector<1x1xf32>
    %38 = vector.shape_cast %37 : vector<1x1xf32> to vector<1x1x1x1xf32>
    %c0_12 = arith.constant 0 : index
    %c0_13 = arith.constant 0 : index
    %c0_14 = arith.constant 0 : index
    %c0_15 = arith.constant 0 : index
    %39 = vector.load %arg6[%c0_12, %c0_13, %c0_14, %c0_15] : memref<1x1x1x1xf32, #tpu.memory_space<vmem>>, vector<1x1x1x1xf32>
    tpu.vector_store %arg6[%c0_12, %c0_13, %c0_14, %c0_15], %38 {strides = array<i32>} : memref<1x1x1x1xf32, #tpu.memory_space<vmem>>, vector<1x1x1x1xf32>,
    return
  }
  func.func @transform_0(%arg0: i32, %arg1: i32) -> i32 {
    %c0_i32 = arith.constant 0 : i32
    %c0_i32_0 = arith.constant 0 : i32
    return %c0_i32 : i32
  }
  func.func @transform_1(%arg0: i32, %arg1: i32) -> (i32, i32) {
    %c0_i32 = arith.constant 0 : i32
    %c0_i32_0 = arith.constant 0 : i32
    %c0_i32_1 = arith.constant 0 : i32
    return %c0_i32, %c0_i32_0 : i32, i32
  }
  func.func @transform_2(%arg0: i32, %arg1: i32) -> (i32, i32, i32) {
    %c0_i32 = arith.constant 0 : i32
    %c0_i32_0 = arith.constant 0 : i32
    %c0_i32_1 = arith.constant 0 : i32
    return %arg0, %c0_i32, %c0_i32_0 : i32, i32, i32
  }
  func.func @transform_3(%arg0: i32, %arg1: i32) -> (i32, i32, i32) {
    %c0_i32 = arith.constant 0 : i32
    %c0_i32_0 = arith.constant 0 : i32
    %c0_i32_1 = arith.constant 0 : i32
    return %arg0, %c0_i32, %c0_i32_0 : i32, i32, i32
  }
  func.func @transform_4(%arg0: i32, %arg1: i32) -> (i32, i32, i32, i32) {
    %c0_i32 = arith.constant 0 : i32
    %c0_i32_0 = arith.constant 0 : i32
    %c0_i32_1 = arith.constant 0 : i32
    return %arg0, %arg1, %c0_i32, %c0_i32_0 : i32, i32, i32, i32
  }
}

</mosaic_0001>

<bundles_post_ra>
// kernel: tpu_custom_call.1
= control target key start
LH: loop header
LB: loop body
LE: loop exit
PB: predicated region body
PF: predicated region fallthrough
CT: control target
= control target key end

     0   :  { %s2466_s0 = inlined_call_operand.hbm [shape: f32[4], index: 0, kind: input, shape index: {}]   ;;  %s2467_s1 = inlined_call_operand.hbm [shape: f32[256,256], index: 1, kind: input, shape index: {}]   ;;  %s2468_s2 = inlined_call_operand.hbm [shape: s32[2,1,256], index: 2, kind: input, shape index: {}]   ;;  %s2469_s3 = inlined_call_operand.hbm [shape: f32[2,4,256], index: 3, kind: input, shape index: {}]   ;;  %s2470_s4 = inlined_call_operand.vmem [shape: f32[2,4,1,1], index: 4, kind: output, shape index: {}]  }
   0x1   :  { %2473 = sst [smem:[#allocation14_spill]] %s2466_s0 }
   0x2   :  { %2474 = sst [smem:[#allocation15_spill]] %s2467_s1 }
   0x3   :  { %2475 = sst [smem:[#allocation16_spill]] %s2468_s2 }
   0x4   :  { %9 = vsyncpa [#allocation5], 0 }
   0x5   :  { %10 = vsyncpa [#allocation4], 0 }
   0x6   :  { %11 = vsyncpa [#allocation8], 0 }
   0x7   :  { %13 = vsyncpa [#allocation8 + $0x1], 0  ;;  %s1668_s15 = smov 0   ;;  %s1670_s16 = smov 0  }
   0x8   :  { %s1672_s17 = smov 0   ;;  %s1674_s18 = smov 0  }
   0x9   :  { %s1676_s19 = smov 0   ;;  %s1678_s20 = smov 0  }
   0xa   :  { %s1680_s21 = smov 0   ;;  %s1682_s22 = smov 0  }
   0xb LB: > { %s28_s23 = sadd.s32 1, %s1627_s20  ;;  %s31_s24 = sadd.s32 1, %s1631_s21  ;;  %s1635_s22 = sphi %s1682_s22, %s19_s22   ;;  %s1631_s21 = sphi %s1680_s21, %s2495_s21   ;;  %s1627_s20 = sphi %s1678_s20, %s2494_s20   ;;  %s1623_s19 = sphi %s1676_s19, %s2493_s19   ;;  %s1619_s18 = sphi %s1674_s18, %s2492_s18   ;;  %s1615_s17 = sphi %s1672_s17, %s2491_s17   ;;  %s1611_s16 = sphi %s1670_s16, %s2490_s16   ;;  %s1607_s15 = sphi %s1668_s15, %s2489_s15  }
   0xc   : > { %p29_p0 = scmp.ge.s32.totalorder %s28_s23, 4  ;;  %s80_s25 = sadd.s32 1, %s1615_s17 }
   0xd   : > { %p87_p1 = scmp.ne.s32.totalorder %s1615_s17, %s1611_s16  ;;  %p88_p2 = scmp.eq.s32.totalorder %s1635_s22, 0 }
   0xe   : > { %s2497_s23 = smov (%p29_p0, %s28_s23), 0  ;;  %s2499_s24 = smov (!%p29_p0, %s31_s24), %s1631_s21 }
   0xf   : > { %p1717_p3 = por %p88_p2, %p87_p1  ;;  %p33_p4 = scmp.ge.s32.totalorder %s2499_s24, 2 }
  0x10   : > { %p1314_p5 = scmp.lt.s32.totalorder %s1635_s22, 8  ;;  %s195_s27 = sand.u32 1, %s1635_s22  }
  0x11   : > { %s197_s28 = sand.u32 1, %s1615_s17   ;;  %s2501_s24 = smov (%p33_p4, %s2499_s24), 0 }
  0x12   : > { %2477 = sst [smem:[#allocation13_spill]] %s2501_s24  ;;  %s1263_s29 = sshll.u32 %s197_s28, 1 }
  0x13   : > { %s77_s30 = ssub.s32 %s1631_s21, %s2501_s24  ;;  %s1264_s5 = sshll.u32 %s1631_s21, 1 }
  0x14   : > { %p78_p6 = scmp.eq.s32.totalorder %s77_s30, 0  ;;  %s2478_s2 = sld [smem:[#allocation16_spill]] }
  0x15   : > { %s199_s9 = scalar_lea.vmem [#allocation7], %s1263_s29  ;;  %p1739_p7 = pnand %p1314_p5, %p1717_p3 }
  0x16   : > { %s207_s10 = sshll.u32 %s199_s9, 4  ;;  %s1265_s14 = sshll.u32 %s197_s28, 3  ;;  %s208_s10 = int_to_ptr.vmem [resolvable:$true] %s207_s10 }
  0x17   : > { %s1733_s11 = scalar_select %p78_p6, %s1615_s17, %s80_s25  }
  0x18   : > { %s1743_s30 = scalar_lea.sflag [#allocation8], %s195_s27  ;;  %s2471_s29 = sadd.s32 4294967295, %s1635_s22  }
  0x19   : > { %p93_p8 = scmp.ne.s32.totalorder %s1611_s16, %s1607_s15  ;;  %p1753_p9 = scmp.eq.s32.totalorder %s2471_s29, 0 }
  0x1a   : > { %s203_s8 = scalar_lea.hbm %s2478_s2, %s1264_s5  ;;  %p1259_p10 = scmp.ge.s32.totalorder %s1635_s22, 1 }
  0x1b   : > { %s205_s12 = sshll.u32 %s203_s8, 4  ;;  %p158_p11 = scmp.lt.s32.totalorder %s1635_s22, 9  ;;  %s206_s12 = int_to_ptr.hbm [resolvable:$true] %s205_s12 }
  0x1c   : > { %1308 = dma.hbm_to_vmem [thread:$0]  (!%p1739_p7), %s206_s12, 32, %s208_s10, %s1743_s30  }
  0x1d   : > { %p1761_p12 = por %p1753_p9, %p93_p8  ;;  %s2482_s0 = sld [smem:[#allocation14_spill]] }
  0x1e   : > { %p1768_p13 = pnand %p1259_p10, %p158_p11  ;;  %s2484_s1 = sld [smem:[#allocation15_spill]] }
  0x1f   : > { %s1637_s9 = smov [#allocation6]   ;;  %s1638_s12 = smov [#allocation3]  }
  0x20   : > { %p1298_p0 = pneg %p1768_p13  ;;  %s181_s10 = sshll.u32 %s1637_s9, 4  ;;  %s182_s10 = int_to_ptr.vmem [resolvable:$true] %s181_s10 }
  0x21   : > { %s1639_s27 = smov 256   ;;  %s1640_s28 = smov 16  }
  0x22   : > { %p1299_p1 = pnand %p1298_p0, %p1753_p9  ;;  %s1280_s29 = sshll.u32 %s1631_s21, 3 }
  0x23   : > { %s170_s5 = sshll.u32 %s2482_s0, 4  ;;  %s218_s0 = scalar_lea.vmem [#allocation9], %s1265_s14  ;;  %s171_s5 = int_to_ptr.hbm [resolvable:$true] %s170_s5 }
  0x24   : > { %s179_s8 = sshll.u32 %s2484_s1, 4  ;;  %s227_s2 = sshll.u32 %s218_s0, 4  ;;  %s180_s8 = int_to_ptr.hbm [resolvable:$true] %s179_s8  ;;  %s228_s2 = int_to_ptr.vmem [resolvable:$true] %s227_s2 }
  0x25   : > { %1301 = dma.hbm_to_smem (!%p1299_p1), %s171_s5, 16, %s1638_s12, [#allocation5]  }
  0x26   : > { %1304 = dma.hbm_to_vmem [thread:$0]  (!%p1299_p1), %s180_s8, 8192, %s182_s10, [#allocation4], %s1639_s27, %s1639_s27, %s1640_s28  }
  0x27   : > { %s223_s1 = scalar_lea.hbm %s2469_s3, %s1280_s29  ;;  %236 = sbr.rel (%p1768_p13) target bundleno = 518 (0x206), region = 36 }
  0x28   : > { %s225_s24 = sshll.u32 %s223_s1, 4  ;;  %s226_s24 = int_to_ptr.hbm [resolvable:$true] %s225_s24 }
  0x29   : > { %1311 = dma.hbm_to_vmem [thread:$0]  (!%p1739_p7), %s226_s24, 128, %s228_s2, %s1743_s30  }
  0x2c   : > { %1594 = dma.done.wait (%p1753_p9), [#allocation5], 16  }
  0x2d   : > { %1596 = vsyncadd (%p1753_p9), [#allocation5], 4294967280 }
  0x2e   : > { %1598 = dma.done.wait (%p1753_p9), [#allocation4], 8192  }
  0x2f   : > { %1600 = vsyncadd (%p1753_p9), [#allocation4], 4294959104  ;;  %s2485_s0 = sadd.s32 4294967295, %s1635_s22   ;;  %s250_s2 = sand.u32 1, %s1611_s16  }
  0x30   : > { %s248_s1 = sand.u32 1, %s2485_s0   ;;  %s1271_s24 = sshll.u32 %s250_s2, 1 }
  0x31   : > { %s249_s13 = scalar_lea.sflag [#allocation8], %s248_s1  ;;  %s252_s14 = scalar_lea.vmem [#allocation7], %s1271_s24 }
  0x32   : > { %1602 = dma.done.wait (%p1761_p12), %s249_s13, 160  }
  0x33   : > { %1604 = vsyncadd (%p1761_p12), %s249_s13, 4294967136  ;;  %s1272_s30 = sshll.u32 %s250_s2, 3 }
  0x34   : > { %s262_s29 = scalar_lea.vmem [#allocation9], %s1272_s30 }
  0x35   : > { %268 = sfence }
  0x36   : > { %p296_p2 = scmp.lt.s32.totalorder %s1623_s19, 1  ;;  %p298_p3 = scmp.lt.s32.totalorder %s1619_s18, 3  ;;  %v1805_v0 = vld [vmem:[%s252_s14] sm:$0x3] }
  0x37   : > { %p1274_p4 = scmp.ne.s32.totalorder %s1619_s18, 0 }
  0x38   : > { %s2503_s19 = smov (!%p296_p2, %s1623_s19), 1 }
  0x39   : > { %s299_s25 = scalar_select %p298_p3, %s1619_s18, 3 }
  0x3a   : > { %s1273_s5 = sshll.u32 %s2503_s19, 2  ;;  %307 = sbr.rel (%p1274_p4) target bundleno = 145 (0x91), region = 56 }
  0x3b   : > { %s1809_s15 = sadd.s32 %s1273_s5, %s299_s25 }
  0x3c   : > { %s302_s9 = scalar_lea.vmem %s2470_s4, %s1809_s15 }
  0x3f   : > { %v308_v1 = vld [vmem:[%s262_s29] sm:$0xff]  ;;  %vm315_vm0 = vcmask 1043456   ;;  %vm378_vm1 = vcmp.lt.s32.totalorder %v1805_v0, 4  ;;  %v1641_v41 = vmov 0.0  }
  0x40   : > { %310 = vst [vmem:[#allocation1] ss:$2 sm:$0xff] %v308_v1  ;;  %v1275_v42 = vsel %vm378_vm1, 1.0, %v1641_v41 }
  0x41   : > { %v383_v45 = vperm.slane %v1275_v42, 1  ;;  %v382_v50 = vperm.slane %v1275_v42, 0 }
  0x43   : > { %v384_v51 = vrot.slane %v383_v45, 4 }
  0x45   : > { %v385_v56 = vsel %vm315_vm0, %v382_v50, %v384_v51 }
  0x47   : > { %v311_v2 = vld.sshfl [vmem:[#allocation1] sm:$0xff pattern:$0x75316420]  ;;  %v312_v3 = vld.sshfl [vmem:[#allocation1 + $0x8] sm:$0xff pattern:$0x75316420] }
  0x48   : > { %v316_v4 = vsel %vm315_vm0, %v311_v2, -inf  ;;  %v323_v5 = vsel %vm315_vm0, %v312_v3, -inf }
  0x49   : > { %v317_v6 = vrot.slane %v316_v4, 4  ;;  %v324_v7 = vrot.slane %v323_v5, 4 }
  0x4b   : > { %v318_v8 = vmax.f32 %v316_v4, %v317_v6  ;;  %v325_v9 = vmax.f32 %v323_v5, %v324_v7 }
  0x4d   : > { %v319_v10 = vrot.slane %v318_v8, 2  ;;  %v326_v11 = vrot.slane %v325_v9, 2 }
  0x4f   : > { %v320_v12 = vmax.f32 %v318_v8, %v319_v10  ;;  %v327_v13 = vmax.f32 %v325_v9, %v326_v11 }
  0x51   : > { %v321_v14 = vrot.slane %v320_v12, 1  ;;  %v328_v15 = vrot.slane %v327_v13, 1 }
  0x53   : > { %v329_v16 = vmax.f32 %v327_v13, %v328_v15  ;;  %v322_v17 = vmax.f32 %v320_v12, %v321_v14 }
  0x55   : > { %v332_v18 = vrot.slane %v329_v16, 4 }
  0x57   : > { %v333_v19 = vsel %vm315_vm0, %v322_v17, %v332_v18 }
  0x58   : > { %v335_v20 = vsub.f32 %v308_v1, %v333_v19 }
  0x5a   : > { %v336_v21 = vmul.f32 1.442695, %v335_v20 }
  0x5c   : > { %1387 = vpow2.f32 %v336_v21 }
  0x62   : > { %v1388_v22 = vpop.eup %1387 }
  0x63   : > { %339 = vst [vmem:[#allocation1] ss:$2 sm:$0xff] %v1388_v22 }
  0x6a   : > { %v340_v23 = vld.sshfl [vmem:[#allocation1] sm:$0xff pattern:$0x75316420]  ;;  %v341_v24 = vld.sshfl [vmem:[#allocation1 + $0x8] sm:$0xff pattern:$0x75316420] }
  0x6b   : > { %v344_v25 = vsel %vm315_vm0, %v340_v23, 0.0  ;;  %v351_v26 = vsel %vm315_vm0, %v341_v24, 0.0 }
  0x6c   : > { %v345_v27 = vrot.slane %v344_v25, 4  ;;  %v352_v28 = vrot.slane %v351_v26, 4 }
  0x6e   : > { %v346_v29 = vadd.f32 %v345_v27, %v344_v25  ;;  %v353_v30 = vadd.f32 %v352_v28, %v351_v26 }
  0x70   : > { %v347_v31 = vrot.slane %v346_v29, 2  ;;  %v354_v32 = vrot.slane %v353_v30, 2 }
  0x72   : > { %v348_v33 = vadd.f32 %v347_v31, %v346_v29  ;;  %v355_v34 = vadd.f32 %v354_v32, %v353_v30 }
  0x74   : > { %v349_v35 = vrot.slane %v348_v33, 1  ;;  %v356_v36 = vrot.slane %v355_v34, 1 }
  0x76   : > { %v357_v37 = vadd.f32 %v356_v36, %v355_v34  ;;  %v350_v38 = vadd.f32 %v349_v35, %v348_v33 }
  0x78   : > { %v360_v39 = vrot.slane %v357_v37, 4 }
  0x7a   : > { %v361_v40 = vsel %vm315_vm0, %v350_v38, %v360_v39 }
  0x7b   : > { %1389 = vrcp.f32 %v361_v40  ;;  %v374_v47 = vand.u32 2147483648, %v361_v40  ;;  %v372_v49 = vand.u32 2147483647, %v361_v40  ;;  %vm368_vm3 = vweird.f32 %v361_v40 }
  0x7d   : > { %v375_v53 = vor.u32 1.1754944e-38, %v374_v47  ;;  %vm373_vm5 = vcmp.eq.f32.partialorder %v372_v49, 8.507059e+37 }
  0x81   : > { %v1390_v43 = vpop.eup %1389 }
  0x82   : > { %v364_v44 = vmul.f32 %v1390_v43, %v361_v40  ;;  %vm369_vm2 = vweird.f32 %v1390_v43 }
  0x83   : > { %vm370_vm4 = vmor %vm368_vm3, %vm369_vm2 }
  0x84   : > { %v365_v46 = vsub.f32 1.0, %v364_v44 }
  0x86   : > { %v366_v48 = vmul.f32 %v1390_v43, %v365_v46 }
  0x88   : > { %v367_v52 = vadd.f32 %v1390_v43, %v366_v48 }
  0x8a   : > { %v371_v54 = vsel %vm370_vm4, %v1390_v43, %v367_v52 }
  0x8b   : > { %v376_v55 = vsel %vm373_vm5, %v375_v53, %v371_v54 }
  0x8c   : > { %v377_v57 = vmul.f32 %v1388_v22, %v376_v55 }
  0x8e   : > { %v387_v58 = vmul.f32 %v385_v56, %v377_v57 }
  0x90   : > { %388 = vst [vmem:[#allocation2] sm:$0xff] %v387_v58 }
  0x91 PF: > { %v398_v59 = vstv %s1619_s18  ;;  %v431_v61 = vld [vmem:[#allocation6 + $0xf0] sm:$0xff]  ;;  %v1642_v62 = vmov 1e+30   ;;  %v432_v1 = vld [vmem:[#allocation6 + $0xf8] sm:$0xff]  ;;  %v429_v2 = vld [vmem:[#allocation6 + $0xe0] sm:$0xff]  ;;  %s389_s19 = sshra.s32 %s1619_s18, 2 }
  0x92   : > { %vm1826_vm6 = vcmp.eq.s32.totalorder %v1805_v0, %v398_v59  ;;  %v430_v3 = vld [vmem:[#allocation6 + $0xe8] sm:$0xff]  ;;  %v427_v6 = vld [vmem:[#allocation6 + $0xd0] sm:$0xff]  ;;  %v428_v7 = vld [vmem:[#allocation6 + $0xd8] sm:$0xff]  ;;  %s392_s10 = sand.u32 3, %s1619_s18  ;;  %s1281_s12 = sshll.u32 %s389_s19, 3  ;;  %vm1103_vm7 = vcmask 1040384  }
  0x93   : > { %v400_v63 = vsel %vm1826_vm6, 0.0, %v1642_v62  ;;  %v463_v11 = vld [vmem:[#allocation6 + $0x1f0] sm:$0xff]  ;;  %v464_v14 = vld [vmem:[#allocation6 + $0x1f8] sm:$0xff]  ;;  %v461_v15 = vld [vmem:[#allocation6 + $0x1e0] sm:$0xff]  ;;  %s1935_s27 = sadd.s32 %s1281_s12, %s392_s10  ;;  %s1119_s7 = sld [smem:[#allocation3 + %s1619_s18]] }
  0x94   : > { %v1832_v4 = vperm.slane %v400_v63, 0  ;;  %v1834_v5 = vperm.slane %v400_v63, 1  ;;  %v462_v16 = vld [vmem:[#allocation6 + $0x1e8] sm:$0xff]  ;;  %v459_v19 = vld [vmem:[#allocation6 + $0x1d0] sm:$0xff]  ;;  %v460_v20 = vld [vmem:[#allocation6 + $0x1d8] sm:$0xff]  ;;  %s396_s28 = scalar_lea.vmem [#allocation2], %s1935_s27 }
  0x95   : > { %v457_v30 = vld [vmem:[#allocation6 + $0x1c0] sm:$0xff]  ;;  %v458_v32 = vld [vmem:[#allocation6 + $0x1c8] sm:$0xff]  ;;  %v423_v35 = vld [vmem:[#allocation6 + $0xb0] sm:$0xff] }
  0x96   : > { %v500_v8 = vadd.f32 %v1832_v4, %v431_v61  ;;  %v501_v0 = vadd.f32 %v1834_v5, %v432_v1  ;;  %v498_v9 = vadd.f32 %v1832_v4, %v429_v2  ;;  %v499_v10 = vadd.f32 %v1834_v5, %v430_v3  ;;  %v425_v33 = vld [vmem:[#allocation6 + $0xc0] sm:$0xff]  ;;  %v426_v34 = vld [vmem:[#allocation6 + $0xc8] sm:$0xff]  ;;  %v424_v36 = vld [vmem:[#allocation6 + $0xb8] sm:$0xff] }
  0x97   : > { %v496_v12 = vadd.f32 %v1832_v4, %v427_v6  ;;  %v497_v13 = vadd.f32 %v1834_v5, %v428_v7  ;;  %v532_v22 = vadd.f32 %v1832_v4, %v463_v11  ;;  %v533_v23 = vadd.f32 %v1834_v5, %v464_v14  ;;  %v455_v45 = vld [vmem:[#allocation6 + $0x1b0] sm:$0xff]  ;;  %v456_v47 = vld [vmem:[#allocation6 + $0x1b8] sm:$0xff]  ;;  %v421_v48 = vld [vmem:[#allocation6 + $0xa0] sm:$0xff] }
  0x98   : > { %v579_v17 = vmin.f32 %v500_v8, %v501_v0  ;;  %v576_v18 = vmin.f32 %v498_v9, %v499_v10  ;;  %v530_v24 = vadd.f32 %v1832_v4, %v461_v15  ;;  %v531_v25 = vadd.f32 %v1834_v5, %v462_v16  ;;  %v422_v49 = vld [vmem:[#allocation6 + $0xa8] sm:$0xff]  ;;  %v453_v50 = vld [vmem:[#allocation6 + $0x1a0] sm:$0xff]  ;;  %v451_v61 = vld [vmem:[#allocation6 + $0x190] sm:$0xff] }
  0x99   : > { %v573_v21 = vmin.f32 %v496_v12, %v497_v13  ;;  %v528_v26 = vadd.f32 %v1832_v4, %v459_v19  ;;  %v529_v27 = vadd.f32 %v1834_v5, %v460_v20  ;;  %v627_v28 = vmin.f32 %v532_v22, %v533_v23  ;;  %v454_v51 = vld [vmem:[#allocation6 + $0x1a8] sm:$0xff]  ;;  %v452_v63 = vld [vmem:[#allocation6 + $0x198] sm:$0xff]  ;;  %v419_v1 = vld [vmem:[#allocation6 + $0x90] sm:$0xff] }
  0x9a   : > { %580 = vmin.xlane.f32.xlu0 %v579_v17  ;;  %577 = vmin.xlane.f32.xlu1 %v576_v18  ;;  %v624_v29 = vmin.f32 %v530_v24, %v531_v25  ;;  %v526_v37 = vadd.f32 %v1832_v4, %v457_v30  ;;  %v527_v38 = vadd.f32 %v1834_v5, %v458_v32  ;;  %v420_v2 = vld [vmem:[#allocation6 + $0x98] sm:$0xff]  ;;  %v417_v3 = vld [vmem:[#allocation6 + $0x80] sm:$0xff]  ;;  %v418_v6 = vld [vmem:[#allocation6 + $0x88] sm:$0xff] }
  0x9b   : > { %574 = vmin.xlane.f32.xlu2 %v573_v21  ;;  %v621_v31 = vmin.f32 %v528_v26, %v529_v27  ;;  %v494_v39 = vadd.f32 %v1832_v4, %v425_v33  ;;  %v495_v40 = vadd.f32 %v1834_v5, %v426_v34  ;;  %v492_v41 = vadd.f32 %v1832_v4, %v423_v35  ;;  %v439_v12 = vld [vmem:[#allocation6 + $0x130] sm:$0xff]  ;;  %v440_v13 = vld [vmem:[#allocation6 + $0x138] sm:$0xff]  ;;  %v449_v16 = vld [vmem:[#allocation6 + $0x180] sm:$0xff] }
  0x9c   : > { %v493_v42 = vadd.f32 %v1834_v5, %v424_v36  ;;  %v618_v43 = vmin.f32 %v526_v37, %v527_v38  ;;  %v524_v52 = vadd.f32 %v1832_v4, %v455_v45  ;;  %v525_v53 = vadd.f32 %v1834_v5, %v456_v47  ;;  %v450_v17 = vld [vmem:[#allocation6 + $0x188] sm:$0xff]  ;;  %v407_v21 = vld [vmem:[#allocation6 + $0x30] sm:$0xff]  ;;  %v408_v22 = vld [vmem:[#allocation6 + $0x38] sm:$0xff] }
  0x9d   : > { %v570_v44 = vmin.f32 %v494_v39, %v495_v40  ;;  %v490_v54 = vadd.f32 %v1832_v4, %v421_v48  ;;  %v491_v55 = vadd.f32 %v1834_v5, %v422_v49  ;;  %v522_v56 = vadd.f32 %v1832_v4, %v453_v50  ;;  %v405_v23 = vld [vmem:[#allocation6 + $0x20] sm:$0xff]  ;;  %v415_v25 = vld [vmem:[#allocation6 + $0x70] sm:$0xff]  ;;  %v416_v26 = vld [vmem:[#allocation6 + $0x78] sm:$0xff] }
  0x9e   : > { %v567_v46 = vmin.f32 %v492_v41, %v493_v42  ;;  %v523_v57 = vadd.f32 %v1834_v5, %v454_v51  ;;  %v615_v58 = vmin.f32 %v524_v52, %v525_v53  ;;  %v520_v7 = vadd.f32 %v1832_v4, %v451_v61  ;;  %v448_v32 = vld [vmem:[#allocation6 + $0x178] sm:$0xff]  ;;  %v437_v42 = vld [vmem:[#allocation6 + $0x120] sm:$0xff]  ;;  %v446_v47 = vld [vmem:[#allocation6 + $0x168] sm:$0xff] }
  0x9f   : > { %v564_v59 = vmin.f32 %v490_v54, %v491_v55  ;;  %v521_v8 = vadd.f32 %v1834_v5, %v452_v63  ;;  %v488_v0 = vadd.f32 %v1832_v4, %v419_v1  ;;  %v489_v9 = vadd.f32 %v1834_v5, %v420_v2  ;;  %v435_v51 = vld [vmem:[#allocation6 + $0x110] sm:$0xff]  ;;  %v436_v52 = vld [vmem:[#allocation6 + $0x118] sm:$0xff]  ;;  %v413_v55 = vld [vmem:[#allocation6 + $0x60] sm:$0xff] }
  0xa0   : > { %v612_v62 = vmin.f32 %v522_v56, %v523_v57  ;;  %v486_v10 = vadd.f32 %v1832_v4, %v417_v3  ;;  %v487_v11 = vadd.f32 %v1834_v5, %v418_v6  ;;  %v1867_v14 = vadd.f32 %v1832_v4, %v439_v12  ;;  %v403_v53 = vld [vmem:[#allocation6 + $0x10] sm:$0xff]  ;;  %v414_v56 = vld [vmem:[#allocation6 + $0x68] sm:$0xff]  ;;  %v412_v63 = vld [vmem:[#allocation6 + $0x58] sm:$0xff] }
  0xa1   : > { %v1870_v15 = vadd.f32 %v1834_v5, %v440_v13  ;;  %v609_v18 = vmin.f32 %v520_v7, %v521_v8  ;;  %v561_v19 = vmin.f32 %v488_v0, %v489_v9  ;;  %v1875_v27 = vadd.f32 %v1832_v4, %v407_v21  ;;  %v434_v12 = vld [vmem:[#allocation6 + $0x108] sm:$0xff] }
  0xa2   : > { %628 = vmin.xlane.f32.xlu0 %v627_v28  ;;  %625 = vmin.xlane.f32.xlu1 %v624_v29  ;;  %v558_v24 = vmin.f32 %v486_v10, %v487_v11  ;;  %v1878_v28 = vadd.f32 %v1834_v5, %v408_v22  ;;  %v406_v29 = vld [vmem:[#allocation6 + $0x28] sm:$0xff]  ;;  %v1881_v30 = vadd.f32 %v1832_v4, %v405_v23  ;;  %v433_v11 = vld [vmem:[#allocation6 + $0x100] sm:$0xff] }
  0xa3   : > { %622 = vmin.xlane.f32.xlu2 %v621_v31  ;;  %v591_v20 = vmin.f32 %v1867_v14, %v1870_v15  ;;  %v447_v31 = vld [vmem:[#allocation6 + $0x170] sm:$0xff]  ;;  %v1884_v33 = vadd.f32 %v1834_v5, %v406_v29  ;;  %v518_v34 = vadd.f32 %v1832_v4, %v449_v16  ;;  %v519_v35 = vadd.f32 %v1834_v5, %v450_v17  ;;  %v401_v22 = vld [vmem:[#allocation6] sm:$0xff]  ;;  %v402_v23 = vld [vmem:[#allocation6 + $0x8] sm:$0xff] }
  0xa4   : > { %v543_v36 = vmin.f32 %v1875_v27, %v1878_v28  ;;  %v484_v37 = vadd.f32 %v1832_v4, %v415_v25  ;;  %v485_v38 = vadd.f32 %v1834_v5, %v416_v26  ;;  %v516_v40 = vadd.f32 %v1832_v4, %v447_v31  ;;  %v444_v25 = vld [vmem:[#allocation6 + $0x158] sm:$0xff]  ;;  %v409_v26 = vld [vmem:[#allocation6 + $0x40] sm:$0xff]  ;;  %v410_v29 = vld [vmem:[#allocation6 + $0x48] sm:$0xff] }
  0xa5   : > { %v540_v39 = vmin.f32 %v1881_v30, %v1884_v33  ;;  %v517_v41 = vadd.f32 %v1834_v5, %v448_v32  ;;  %v606_v48 = vmin.f32 %v518_v34, %v519_v35  ;;  %v1905_v57 = vadd.f32 %v1832_v4, %v435_v51  ;;  %v441_v34 = vld [vmem:[#allocation6 + $0x140] sm:$0xff]  ;;  %v442_v35 = vld [vmem:[#allocation6 + $0x148] sm:$0xff] }
  0xa6   : > { %v555_v49 = vmin.f32 %v484_v37, %v485_v38  ;;  %v1911_v61 = vadd.f32 %v1832_v4, %v403_v53  ;;  %v515_v3 = vadd.f32 %v1834_v5, %v446_v47  ;;  %v482_v7 = vadd.f32 %v1832_v4, %v413_v55 }
  0xa7   : > { %v603_v54 = vmin.f32 %v516_v40, %v517_v41  ;;  %v483_v8 = vadd.f32 %v1834_v5, %v414_v56  ;;  %v481_v10 = vadd.f32 %v1834_v5, %v412_v63  ;;  %v502_v13 = vadd.f32 %v1832_v4, %v433_v11 }
  0xa8   : > { %v503_v16 = vadd.f32 %v1834_v5, %v434_v12  ;;  %v470_v31 = vadd.f32 %v1832_v4, %v401_v22  ;;  %v471_v32 = vadd.f32 %v1834_v5, %v402_v23  ;;  %v513_v40 = vadd.f32 %v1834_v5, %v444_v25 }
  0xa9   : > { %v478_v41 = vadd.f32 %v1832_v4, %v409_v26 }
  0xaa   : > { %619 = vmin.xlane.f32.xlu1 %v618_v43  ;;  %571 = vmin.xlane.f32.xlu0 %v570_v44  ;;  %v438_v43 = vld [vmem:[#allocation6 + $0x128] sm:$0xff]  ;;  %v1897_v44 = vadd.f32 %v1832_v4, %v437_v42  ;;  %v582_v21 = vmin.f32 %v502_v13, %v503_v16  ;;  %v534_v38 = vmin.f32 %v470_v31, %v471_v32 }
  0xab   : > { %568 = vmin.xlane.f32.xlu2 %v567_v46  ;;  %v1900_v45 = vadd.f32 %v1834_v5, %v438_v43  ;;  %v445_v46 = vld [vmem:[#allocation6 + $0x160] sm:$0xff]  ;;  %v479_v42 = vadd.f32 %v1834_v5, %v410_v29  ;;  %v510_v43 = vadd.f32 %v1832_v4, %v441_v34 }
  0xac   : > { %v514_v2 = vadd.f32 %v1832_v4, %v445_v46  ;;  %v511_v46 = vadd.f32 %v1834_v5, %v442_v35 }
  0xad   : > { %v588_v50 = vmin.f32 %v1897_v44, %v1900_v45 }
  0xae   : > { %v600_v17 = vmin.f32 %v514_v2, %v515_v3 }
  0xb2   : > { %616 = vmin.xlane.f32.xlu0 %v615_v58  ;;  %565 = vmin.xlane.f32.xlu1 %v564_v59  ;;  %v1908_v58 = vadd.f32 %v1834_v5, %v436_v52  ;;  %v404_v59 = vld [vmem:[#allocation6 + $0x18] sm:$0xff] }
  0xb3   : > { %613 = vmin.xlane.f32.xlu2 %v612_v62  ;;  %v411_v62 = vld [vmem:[#allocation6 + $0x50] sm:$0xff]  ;;  %v473_v1 = vadd.f32 %v1834_v5, %v404_v59 }
  0xb4   : > { %v585_v6 = vmin.f32 %v1905_v57, %v1908_v58  ;;  %v480_v9 = vadd.f32 %v1832_v4, %v411_v62 }
  0xb5   : > { %v537_v0 = vmin.f32 %v1911_v61, %v473_v1 }
  0xba   : > { %610 = vmin.xlane.f32.xlu1 %v609_v18  ;;  %562 = vmin.xlane.f32.xlu0 %v561_v19  ;;  %v552_v18 = vmin.f32 %v482_v7, %v483_v8  ;;  %v443_v19 = vld [vmem:[#allocation6 + $0x150] sm:$0xff] }
  0xbb   : > { %559 = vmin.xlane.f32.xlu2 %v558_v24  ;;  %v549_v24 = vmin.f32 %v480_v9, %v481_v10  ;;  %v512_v37 = vadd.f32 %v1832_v4, %v443_v19  ;;  %v1949_v4 = vld [vmem:[%s396_s28] ss:$4 sm:$0x3] }
  0xbc   : > { %v1097_v5 = vsel %vm1826_vm6, %v1949_v4, 0.0 }
  0xbd   : > { %v597_v47 = vmin.f32 %v512_v37, %v513_v40  ;;  %v1099_v14 = vperm.slane %v1097_v5, 0  ;;  %v1100_v15 = vperm.slane %v1097_v5, 1 }
  0xbf   : > { %v1105_v27 = vsel %vm1103_vm7, %v1100_v15, 0.0 }
  0xc2   : > { %607 = vmin.xlane.f32.xlu0 %v606_v48  ;;  %556 = vmin.xlane.f32.xlu1 %v555_v49  ;;  %v546_v48 = vmin.f32 %v478_v41, %v479_v42  ;;  %v594_v49 = vmin.f32 %v510_v43, %v511_v46 }
  0xc3   : > { %604 = vmin.xlane.f32.xlu2 %v603_v54 }
  0xca   : > { %601 = vmin.xlane.f32.xlu1 %v600_v17  ;;  %553 = vmin.xlane.f32.xlu0 %v552_v18 }
  0xcb   : > { %550 = vmin.xlane.f32.xlu2 %v549_v24 }
  0xd2   : > { %598 = vmin.xlane.f32.xlu0 %v597_v47  ;;  %547 = vmin.xlane.f32.xlu1 %v546_v48 }
  0xd3   : > { %595 = vmin.xlane.f32.xlu2 %v594_v49 }
  0xda   : > { %592 = vmin.xlane.f32.xlu1 %v591_v20  ;;  %544 = vmin.xlane.f32.xlu0 %v543_v36  ;;  %v1104_v20 = vsel %vm1103_vm7, %v1099_v14, 0.0 }
  0xdb   : > { %541 = vmin.xlane.f32.xlu2 %v540_v39  ;;  %v1106_v28 = vadd.f32 %v1105_v27, %v1104_v20 }
  0xe2   : > { %589 = vmin.xlane.f32.xlu0 %v588_v50  ;;  %538 = vmin.xlane.f32.xlu1 %v537_v0 }
  0xe3   : > { %586 = vmin.xlane.f32.xlu2 %v585_v6 }
  0xea   : > { %583 = vmin.xlane.f32.xlu1 %v582_v21  ;;  %535 = vmin.xlane.f32.xlu0 %v534_v38 }
  0xeb   : > { %1107 = vadd.xlane.f32.xlu2 %v1106_v28 }
 0x10d   : > { %v1957_v30 = vpop.xlane.xlu0 %580  ;;  %v1959_v33 = vpop.xlane.xlu1 %577 }
 0x10e   : > { %1391 = vrsqrt.f32 %v1957_v30  ;;  %v1962_v60 = vpop.xlane.xlu2 %574  ;;  %vm817_vm8 = vcmp.eq.f32.partialorder %v1957_v30, inf  ;;  %vm819_vm9 = vcmp.eq.f32.partialorder %v1957_v30, 0.0  ;;  %v820_v62 = vand.u32 2147483648, %v1957_v30 }
 0x10f   : > { %1393 = vrsqrt.f32 %v1959_v33  ;;  %vm805_vm10 = vcmp.eq.f32.partialorder %v1959_v33, inf  ;;  %vm807_vm11 = vcmp.eq.f32.partialorder %v1959_v33, 0.0  ;;  %v808_v3 = vand.u32 2147483648, %v1959_v33 }
 0x110   : > { %1395 = vrsqrt.f32 %v1962_v60  ;;  %vm793_vm12 = vcmp.eq.f32.partialorder %v1962_v60, inf  ;;  %vm795_vm13 = vcmp.eq.f32.partialorder %v1962_v60, 0.0  ;;  %v796_v10 = vand.u32 2147483648, %v1962_v60 }
 0x114   : > { %v1392_v36 = vpop.eup %1391 }
 0x115   : > { %v1394_v39 = vpop.eup %1393  ;;  %v1966_v44 = vpop.xlane.xlu0 %628  ;;  %v811_v50 = vmul.f32 %v1392_v36, %v1957_v30 }
 0x116   : > { %v1968_v45 = vpop.xlane.xlu1 %625  ;;  %v1396_v51 = vpop.eup %1395  ;;  %1397 = vrsqrt.f32 %v1966_v44  ;;  %v799_v53 = vmul.f32 %v1394_v39, %v1959_v33  ;;  %v1012_v17 = vand.u32 2147483648, %v1966_v44  ;;  %vm1009_vm14 = vcmp.eq.f32.partialorder %v1966_v44, inf }
 0x117   : > { %v1972_v52 = vpop.xlane.xlu2 %622  ;;  %1399 = vrsqrt.f32 %v1968_v45  ;;  %v812_v54 = vmul.f32 %v1392_v36, %v811_v50  ;;  %v787_v55 = vmul.f32 %v1396_v51, %v1962_v60  ;;  %vm1011_vm15 = vcmp.eq.f32.partialorder %v1966_v44, 0.0 }
 0x118   : > { %1401 = vrsqrt.f32 %v1972_v52  ;;  %v800_v56 = vmul.f32 %v1394_v39, %v799_v53  ;;  %vm997_vm0 = vcmp.eq.f32.partialorder %v1968_v45, inf  ;;  %vm999_vm1 = vcmp.eq.f32.partialorder %v1968_v45, 0.0 }
 0x119   : > { %v813_v57 = vmul.f32 0.5, %v812_v54  ;;  %v788_v58 = vmul.f32 %v1396_v51, %v787_v55  ;;  %v1000_v47 = vand.u32 2147483648, %v1968_v45  ;;  %vm985_vm2 = vcmp.eq.f32.partialorder %v1972_v52, inf }
 0x11a   : > { %v801_v59 = vmul.f32 0.5, %v800_v56  ;;  %vm987_vm3 = vcmp.eq.f32.partialorder %v1972_v52, 0.0 }
 0x11b   : > { %v814_v61 = vsub.f32 1.5, %v813_v57  ;;  %v789_v63 = vmul.f32 0.5, %v788_v58 }
 0x11c   : > { %v1398_v1 = vpop.eup %1397  ;;  %v802_v2 = vsub.f32 1.5, %v801_v59 }
 0x11d   : > { %v1400_v6 = vpop.eup %1399  ;;  %v1987_v8 = vpop.xlane.xlu0 %571  ;;  %v815_v0 = vmul.f32 %v1392_v36, %v814_v61  ;;  %v790_v9 = vsub.f32 1.5, %v789_v63  ;;  %v1003_v11 = vmul.f32 %v1398_v1, %v1966_v44 }
 0x11e   : > { %v1985_v7 = vpop.xlane.xlu1 %619  ;;  %v1402_v12 = vpop.eup %1401  ;;  %v803_v16 = vmul.f32 %v1394_v39, %v802_v2  ;;  %v991_v18 = vmul.f32 %v1400_v6, %v1968_v45  ;;  %v988_v39 = vand.u32 2147483648, %v1972_v52  ;;  %vm781_vm4 = vcmp.eq.f32.partialorder %v1987_v8, inf }
 0x11f   : > { %1403 = vrsqrt.f32 %v1985_v7  ;;  %v1993_v13 = vpop.xlane.xlu2 %568  ;;  %v816_v19 = vmul.f32 %v815_v0, %v1957_v30  ;;  %v791_v21 = vmul.f32 %v1396_v51, %v790_v9  ;;  %v1004_v22 = vmul.f32 %v1398_v1, %v1003_v11 }
 0x120   : > { %1405 = vrsqrt.f32 %v1987_v8  ;;  %v804_v23 = vmul.f32 %v803_v16, %v1959_v33  ;;  %v992_v24 = vmul.f32 %v1400_v6, %v991_v18  ;;  %v979_v25 = vmul.f32 %v1402_v12, %v1972_v52 }
 0x121   : > { %1407 = vrsqrt.f32 %v1993_v13  ;;  %v818_v26 = vsel %vm817_vm8, %v1957_v30, %v816_v19  ;;  %v792_v29 = vmul.f32 %v791_v21, %v1962_v60  ;;  %v1005_v31 = vmul.f32 0.5, %v1004_v22 }
 0x122   : > { %v821_v32 = vsel %vm819_vm9, %v820_v62, %v818_v26  ;;  %v806_v34 = vsel %vm805_vm10, %v1959_v33, %v804_v23  ;;  %v993_v35 = vmul.f32 0.5, %v992_v24  ;;  %v980_v37 = vmul.f32 %v1402_v12, %v979_v25 }
 0x123   : > { %1057 = vmatpush.msra.mxu0 %v821_v32  ;;  %v809_v38 = vsel %vm807_vm11, %v808_v3, %v806_v34  ;;  %v794_v40 = vsel %vm793_vm12, %v1962_v60, %v792_v29  ;;  %v1006_v41 = vsub.f32 1.5, %v1005_v31  ;;  %vm783_vm5 = vcmp.eq.f32.partialorder %v1987_v8, 0.0 }
 0x124   : > { %v1017_v43 = vmax.f32 %v809_v38, %v821_v32  ;;  %v994_v46 = vsub.f32 1.5, %v993_v35  ;;  %v981_v48 = vmul.f32 0.5, %v980_v37  ;;  %v797_v30 = vsel %vm795_vm13, %v796_v10, %v794_v40 }
 0x125   : > { %v1404_v42 = vpop.eup %1403  ;;  %1058 = vmatpush.msra.mxu0 %v809_v38  ;;  %v2021_v5 = vpop.xlane.xlu0 %616  ;;  %v1007_v15 = vmul.f32 %v1398_v1, %v1006_v41  ;;  %v784_v16 = vand.u32 2147483648, %v1987_v8  ;;  %vm973_vm6 = vcmp.eq.f32.partialorder %v1985_v7, inf  ;;  %vm975_vm7 = vcmp.eq.f32.partialorder %v1985_v7, 0.0 }
 0x126   : > { %v1406_v49 = vpop.eup %1405  ;;  %v2023_v14 = vpop.xlane.xlu1 %565  ;;  %v967_v20 = vmul.f32 %v1404_v42, %v1985_v7  ;;  %v995_v33 = vmul.f32 %v1400_v6, %v994_v46  ;;  %v982_v36 = vsub.f32 1.5, %v981_v48  ;;  %1409 = vrsqrt.f32 %v2021_v5 }
 0x127   : > { %v2028_v27 = vpop.eup %1407  ;;  %v2030_v28 = vpop.xlane.xlu2 %613  ;;  %1059 = vmatpush.msra.mxu0 %v797_v30  ;;  %v1008_v50 = vmul.f32 %v1007_v15, %v1966_v44  ;;  %v775_v51 = vmul.f32 %v1406_v49, %v1987_v8  ;;  %1411 = vrsqrt.f32 %v2023_v14  ;;  %v1021_v54 = vmax.f32 %v1017_v43, %v797_v30 }
 0x128   : > { %v968_v53 = vmul.f32 %v1404_v42, %v967_v20  ;;  %v996_v55 = vmul.f32 %v995_v33, %v1968_v45  ;;  %v983_v56 = vmul.f32 %v1402_v12, %v982_v36  ;;  %v763_v59 = vmul.f32 %v2028_v27, %v1993_v13 }
 0x129   : > { %v1010_v60 = vsel %vm1009_vm14, %v1966_v44, %v1008_v50  ;;  %v776_v57 = vmul.f32 %v1406_v49, %v775_v51  ;;  %1413 = vrsqrt.f32 %v2030_v28  ;;  %v976_v21 = vand.u32 2147483648, %v1985_v7 }
 0x12a   : > { %v969_v58 = vmul.f32 0.5, %v968_v53  ;;  %v1013_v61 = vsel %vm1011_vm15, %v1012_v17, %v1010_v60  ;;  %v998_v62 = vsel %vm997_vm0, %v1968_v45, %v996_v55  ;;  %v984_v63 = vmul.f32 %v983_v56, %v1972_v52 }
 0x12b   : > { %v1025_v1 = vmax.f32 %v1021_v54, %v1013_v61  ;;  %1077 = vmatpush.msra.mxu1 %v1013_v61  ;;  %v777_v2 = vmul.f32 0.5, %v776_v57  ;;  %v1001_v6 = vsel %vm999_vm1, %v1000_v47, %v998_v62  ;;  %v764_v0 = vmul.f32 %v2028_v27, %v763_v59 }
 0x12c   : > { %v970_v3 = vsub.f32 1.5, %v969_v58  ;;  %v986_v44 = vsel %vm985_vm2, %v1972_v52, %v984_v63  ;;  %v2060_v9 = vpop.eup %1409  ;;  %vm769_vm8 = vcmp.eq.f32.partialorder %v1993_v13, inf  ;;  %vm771_vm9 = vcmp.eq.f32.partialorder %v1993_v13, 0.0 }
 0x12d   : > { %1078 = vmatpush.msra.mxu1 %v1001_v6  ;;  %v2064_v11 = vpop.xlane.xlu0 %562  ;;  %v778_v12 = vsub.f32 1.5, %v777_v2  ;;  %v1412_v17 = vpop.eup %1411  ;;  %v989_v19 = vsel %vm987_vm3, %v988_v39, %v986_v44  ;;  %v765_v22 = vmul.f32 0.5, %v764_v0  ;;  %v1029_v23 = vmax.f32 %v1025_v1, %v1001_v6 }
 0x12e   : > { %v2062_v10 = vpop.xlane.xlu1 %610  ;;  %v971_v45 = vmul.f32 %v1404_v42, %v970_v3  ;;  %1415 = vrsqrt.f32 %v2064_v11  ;;  %v751_v52 = vmul.f32 %v1412_v17, %v2023_v14  ;;  %v772_v34 = vand.u32 2147483648, %v1993_v13 }
 0x12f   : > { %v2068_v18 = vpop.xlane.xlu2 %559  ;;  %1079 = vmatpush.msra.mxu1 %v989_v19  ;;  %v779_v24 = vmul.f32 %v1406_v49, %v778_v12  ;;  %v1414_v26 = vpop.eup %1413  ;;  %v766_v29 = vsub.f32 1.5, %v765_v22  ;;  %v955_v35 = vmul.f32 %v2060_v9, %v2021_v5  ;;  %1417 = vrsqrt.f32 %v2062_v10 }
 0x130   : > { %v972_v25 = vmul.f32 %v971_v45, %v1985_v7  ;;  %v752_v40 = vmul.f32 %v1412_v17, %v751_v52  ;;  %v1033_v41 = vmax.f32 %v1029_v23, %v989_v19  ;;  %v943_v46 = vmul.f32 %v1414_v26, %v2030_v28 }
 0x131   : > { %v780_v31 = vmul.f32 %v779_v24, %v1987_v8  ;;  %v767_v38 = vmul.f32 %v2028_v27, %v766_v29  ;;  %v956_v43 = vmul.f32 %v2060_v9, %v955_v35  ;;  %1419 = vrsqrt.f32 %v2068_v18 }
 0x132   : > { %v974_v32 = vsel %vm973_vm6, %v1985_v7, %v972_v25  ;;  %v753_v48 = vmul.f32 0.5, %v752_v40  ;;  %vm757_vm10 = vcmp.eq.f32.partialorder %v2023_v14, inf  ;;  %v944_v33 = vmul.f32 %v1414_v26, %v943_v46 }
 0x133   : > { %v977_v37 = vsel %vm975_vm7, %v976_v21, %v974_v32  ;;  %v782_v42 = vsel %vm781_vm4, %v1987_v8, %v780_v31  ;;  %v768_v7 = vmul.f32 %v767_v38, %v1993_v13  ;;  %v957_v30 = vmul.f32 0.5, %v956_v43 }
 0x134   : > { %1080 = vmatpush.msra.mxu1 %v977_v37  ;;  %v785_v47 = vsel %vm783_vm5, %v784_v16, %v782_v42  ;;  %v2099_v49 = vpop.eup %1415  ;;  %v754_v39 = vsub.f32 1.5, %v753_v48  ;;  %vm759_vm11 = vcmp.eq.f32.partialorder %v2023_v14, 0.0  ;;  %v760_v50 = vand.u32 2147483648, %v2023_v14 }
 0x135   : > { %v1037_v15 = vmax.f32 %v1033_v41, %v785_v47  ;;  %1060 = vmatpush.msra.mxu0 %v785_v47  ;;  %v2101_v20 = vpop.xlane.xlu0 %607  ;;  %v770_v8 = vsel %vm769_vm8, %v1993_v13, %v768_v7  ;;  %v958_v53 = vsub.f32 1.5, %v957_v30  ;;  %vm961_vm12 = vcmp.eq.f32.partialorder %v2021_v5, inf  ;;  %v1418_v54 = vpop.eup %1417 }
 0x136   : > { %v2103_v27 = vpop.xlane.xlu1 %556  ;;  %v773_v51 = vsel %vm771_vm9, %v772_v34, %v770_v8  ;;  %vm963_vm13 = vcmp.eq.f32.partialorder %v2021_v5, 0.0  ;;  %v755_v56 = vmul.f32 %v1412_v17, %v754_v39  ;;  %v945_v60 = vmul.f32 0.5, %v944_v33 }
 0x137   : > { %v2109_v36 = vpop.xlane.xlu2 %604  ;;  %v1041_v55 = vmax.f32 %v1037_v15, %v977_v37  ;;  %1061 = vmatpush.msra.mxu0 %v773_v51  ;;  %v739_v57 = vmul.f32 %v2099_v49, %v2064_v11  ;;  %1421 = vrsqrt.f32 %v2103_v27  ;;  %v959_v58 = vmul.f32 %v2060_v9, %v958_v53  ;;  %v1420_v59 = vpop.eup %1419 }
 0x138   : > { %v964_v13 = vand.u32 2147483648, %v2021_v5  ;;  %vm949_vm14 = vcmp.eq.f32.partialorder %v2030_v28, inf  ;;  %v756_v61 = vmul.f32 %v755_v56, %v2023_v14  ;;  %v946_v62 = vsub.f32 1.5, %v945_v60 }
 0x139   : > { %vm951_vm15 = vcmp.eq.f32.partialorder %v2030_v28, 0.0  ;;  %v740_v63 = vmul.f32 %v2099_v49, %v739_v57  ;;  %1423 = vrsqrt.f32 %v2101_v20  ;;  %v960_v1 = vmul.f32 %v959_v58, %v2021_v5 }
 0x13a   : > { %v952_v2 = vand.u32 2147483648, %v2030_v28  ;;  %v931_v3 = vmul.f32 %v1418_v54, %v2062_v10  ;;  %v1016_v6 = vmax.f32 %v773_v51, %v1041_v55  ;;  %v758_v44 = vsel %vm757_vm10, %v2023_v14, %v756_v61 }
 0x13b   : > { %v947_v0 = vmul.f32 %v1414_v26, %v946_v62  ;;  %v741_v9 = vmul.f32 0.5, %v740_v63  ;;  %v761_v12 = vsel %vm759_vm11, %v760_v50, %v758_v44  ;;  %v962_v16 = vsel %vm961_vm12, %v2021_v5, %v960_v1 }
 0x13c   : > { %v932_v19 = vmul.f32 %v1418_v54, %v931_v3  ;;  %v727_v21 = vmul.f32 %v1420_v59, %v2068_v18  ;;  %1425 = vrsqrt.f32 %v2109_v36  ;;  %v1020_v22 = vmax.f32 %v1016_v6, %v761_v12  ;;  %1062 = vmatpush.msra.mxu0 %v761_v12 }
 0x13d   : > { %v2140_v17 = vpop.xlane.xlu0 %553  ;;  %v965_v23 = vsel %vm963_vm13, %v964_v13, %v962_v16  ;;  %v948_v14 = vmul.f32 %v947_v0, %v2030_v28  ;;  %v1422_v25 = vpop.eup %1421  ;;  %v742_v26 = vsub.f32 1.5, %v741_v9  ;;  %vm745_vm0 = vcmp.eq.f32.partialorder %v2064_v11, inf }
 0x13e   : > { %v2138_v45 = vpop.xlane.xlu1 %601  ;;  %1081 = vmatpush.msra.mxu1 %v965_v23  ;;  %v933_v29 = vmul.f32 0.5, %v932_v19  ;;  %v728_v52 = vmul.f32 %v1420_v59, %v727_v21  ;;  %v1015_v31 = vmax.f32 %v965_v23, %v1020_v22  ;;  %vm747_vm1 = vcmp.eq.f32.partialorder %v2064_v11, 0.0 }
 0x13f   : > { %v2147_v24 = vpop.xlane.xlu2 %550  ;;  %v950_v32 = vsel %vm949_vm14, %v2030_v28, %v948_v14  ;;  %v748_v5 = vand.u32 2147483648, %v2064_v11  ;;  %v1424_v34 = vpop.eup %1423  ;;  %v743_v37 = vmul.f32 %v2099_v49, %v742_v26  ;;  %1427 = vrsqrt.f32 %v2138_v45 }
 0x140   : > { %v953_v35 = vsel %vm951_vm15, %v952_v2, %v950_v32  ;;  %v934_v38 = vsub.f32 1.5, %v933_v29  ;;  %v729_v40 = vmul.f32 0.5, %v728_v52  ;;  %vm937_vm2 = vcmp.eq.f32.partialorder %v2062_v10, inf }
 0x141   : > { %1082 = vmatpush.msra.mxu1 %v953_v35  ;;  %vm939_vm3 = vcmp.eq.f32.partialorder %v2062_v10, 0.0  ;;  %v715_v41 = vmul.f32 %v1422_v25, %v2103_v27  ;;  %1429 = vrsqrt.f32 %v2140_v17  ;;  %v744_v42 = vmul.f32 %v743_v37, %v2064_v11 }
 0x142   : > { %v935_v43 = vmul.f32 %v1418_v54, %v934_v38  ;;  %v730_v28 = vsub.f32 1.5, %v729_v40  ;;  %v2164_v46 = vpop.eup %1425  ;;  %1431 = vrsqrt.f32 %v2147_v24  ;;  %v940_v47 = vand.u32 2147483648, %v2062_v10 }
 0x143   : > { %v716_v7 = vmul.f32 %v1422_v25, %v715_v41  ;;  %v919_v48 = vmul.f32 %v1424_v34, %v2101_v20  ;;  %v1019_v49 = vmax.f32 %v1015_v31, %v953_v35  ;;  %v746_v15 = vsel %vm745_vm0, %v2064_v11, %v744_v42 }
 0x144   : > { %v936_v30 = vmul.f32 %v935_v43, %v2062_v10  ;;  %v731_v33 = vmul.f32 %v1420_v59, %v730_v28  ;;  %v749_v50 = vsel %vm747_vm1, %v748_v5, %v746_v15  ;;  %vm733_vm4 = vcmp.eq.f32.partialorder %v2068_v18, inf }
 0x145   : > { %v2173_v8 = vpop.xlane.xlu0 %598  ;;  %v717_v53 = vmul.f32 0.5, %v716_v7  ;;  %v920_v54 = vmul.f32 %v1424_v34, %v919_v48  ;;  %v1024_v55 = vmax.f32 %v749_v50, %v1019_v49  ;;  %1063 = vmatpush.msra.mxu0 %v749_v50  ;;  %vm735_vm5 = vcmp.eq.f32.partialorder %v2068_v18, 0.0  ;;  %v2187_v57 = vpop.eup %1427 }
 0x146   : > { %v2175_v39 = vpop.xlane.xlu1 %547  ;;  %v938_v56 = vsel %vm937_vm2, %v2062_v10, %v936_v30  ;;  %v732_v60 = vmul.f32 %v731_v33, %v2068_v18  ;;  %v736_v58 = vand.u32 2147483648, %v2068_v18  ;;  %1433 = vrsqrt.f32 %v2173_v8 }
 0x147   : > { %v2180_v51 = vpop.xlane.xlu2 %595  ;;  %v941_v11 = vsel %vm939_vm3, %v940_v47, %v938_v56  ;;  %v718_v13 = vsub.f32 1.5, %v717_v53  ;;  %v921_v59 = vmul.f32 0.5, %v920_v54  ;;  %v1430_v61 = vpop.eup %1429  ;;  %vm721_vm6 = vcmp.eq.f32.partialorder %v2103_v27, inf }
 0x148   : > { %v1028_v62 = vmax.f32 %v1024_v55, %v941_v11  ;;  %1083 = vmatpush.msra.mxu1 %v941_v11  ;;  %v734_v63 = vsel %vm733_vm4, %v2068_v18, %v732_v60  ;;  %v2197_v1 = vpop.eup %1431  ;;  %v907_v6 = vmul.f32 %v2164_v46, %v2109_v36  ;;  %1435 = vrsqrt.f32 %v2175_v39 }
 0x149   : > { %v737_v2 = vsel %vm735_vm5, %v736_v58, %v734_v63  ;;  %v719_v10 = vmul.f32 %v1422_v25, %v718_v13  ;;  %v922_v3 = vsub.f32 1.5, %v921_v59  ;;  %vm723_vm7 = vcmp.eq.f32.partialorder %v2103_v27, 0.0 }
 0x14a   : > { %1064 = vmatpush.msra.mxu0 %v737_v2  ;;  %v724_v44 = vand.u32 2147483648, %v2103_v27  ;;  %vm925_vm8 = vcmp.eq.f32.partialorder %v2101_v20, inf  ;;  %v908_v9 = vmul.f32 %v2164_v46, %v907_v6  ;;  %v703_v12 = vmul.f32 %v1430_v61, %v2140_v17 }
 0x14b   : > { %v720_v18 = vmul.f32 %v719_v10, %v2103_v27  ;;  %v923_v0 = vmul.f32 %v1424_v34, %v922_v3  ;;  %1437 = vrsqrt.f32 %v2180_v51  ;;  %vm927_vm9 = vcmp.eq.f32.partialorder %v2101_v20, 0.0 }
 0x14c   : > { %v928_v16 = vand.u32 2147483648, %v2101_v20  ;;  %v895_v22 = vmul.f32 %v2187_v57, %v2138_v45  ;;  %v1032_v23 = vmax.f32 %v1028_v62, %v737_v2  ;;  %v909_v26 = vmul.f32 0.5, %v908_v9  ;;  %v2221_v29 = vpop.eup %1433 }
 0x14d   : > { %v2213_v21 = vpop.xlane.xlu0 %544  ;;  %v722_v14 = vsel %vm721_vm6, %v2103_v27, %v720_v18  ;;  %v924_v25 = vmul.f32 %v923_v0, %v2101_v20  ;;  %vm913_vm10 = vcmp.eq.f32.partialorder %v2109_v36, inf  ;;  %v704_v31 = vmul.f32 %v1430_v61, %v703_v12 }
 0x14e   : > { %v2211_v19 = vpop.xlane.xlu1 %592  ;;  %v725_v52 = vsel %vm723_vm7, %v724_v44, %v722_v14  ;;  %v896_v32 = vmul.f32 %v2187_v57, %v895_v22  ;;  %v910_v34 = vsub.f32 1.5, %v909_v26  ;;  %vm915_vm11 = vcmp.eq.f32.partialorder %v2109_v36, 0.0  ;;  %v1436_v38 = vpop.eup %1435 }
 0x14f   : > { %1065 = vmatpush.msra.mxu0 %v725_v52  ;;  %v926_v5 = vsel %vm925_vm8, %v2101_v20, %v924_v25  ;;  %v916_v35 = vand.u32 2147483648, %v2109_v36  ;;  %v2232_v37 = vpop.xlane.xlu2 %541  ;;  %v1036_v27 = vmax.f32 %v1032_v23, %v725_v52  ;;  %v705_v41 = vmul.f32 0.5, %v704_v31 }
 0x150   : > { %v929_v40 = vsel %vm927_vm9, %v928_v16, %v926_v5  ;;  %v897_v42 = vmul.f32 0.5, %v896_v32  ;;  %v911_v43 = vmul.f32 %v2164_v46, %v910_v34  ;;  %1439 = vrsqrt.f32 %v2211_v19 }
 0x151   : > { %1084 = vmatpush.msra.mxu1 %v929_v40  ;;  %vm709_vm12 = vcmp.eq.f32.partialorder %v2140_v17, inf  ;;  %vm711_vm13 = vcmp.eq.f32.partialorder %v2140_v17, 0.0  ;;  %v2240_v28 = vpop.eup %1437  ;;  %1441 = vrsqrt.f32 %v2213_v21  ;;  %v706_v47 = vsub.f32 1.5, %v705_v41 }
 0x152   : > { %v898_v7 = vsub.f32 1.5, %v897_v42  ;;  %v691_v20 = vmul.f32 %v2197_v1, %v2147_v24  ;;  %v912_v48 = vmul.f32 %v911_v43, %v2109_v36  ;;  %1443 = vrsqrt.f32 %v2232_v37 }
 0x153   : > { %v712_v46 = vand.u32 2147483648, %v2140_v17  ;;  %v679_v49 = vmul.f32 %v1436_v38, %v2175_v39  ;;  %v1040_v15 = vmax.f32 %v1036_v27, %v929_v40  ;;  %v707_v30 = vmul.f32 %v1430_v61, %v706_v47 }
 0x154   : > { %v899_v33 = vmul.f32 %v2187_v57, %v898_v7  ;;  %v692_v50 = vmul.f32 %v2197_v1, %v691_v20  ;;  %v914_v53 = vsel %vm913_vm10, %v2109_v36, %v912_v48  ;;  %vm901_vm14 = vcmp.eq.f32.partialorder %v2138_v45, inf }
 0x155   : > { %vm903_vm15 = vcmp.eq.f32.partialorder %v2138_v45, 0.0  ;;  %v680_v55 = vmul.f32 %v1436_v38, %v679_v49  ;;  %v917_v56 = vsel %vm915_vm11, %v916_v35, %v914_v53  ;;  %v708_v60 = vmul.f32 %v707_v30, %v2140_v17  ;;  %v2262_v58 = vpop.xlane.xlu0 %589 }
 0x156   : > { %v2256_v54 = vpop.xlane.xlu1 %538  ;;  %v900_v57 = vmul.f32 %v899_v33, %v2138_v45  ;;  %v693_v11 = vmul.f32 0.5, %v692_v50  ;;  %v2264_v13 = vpop.eup %1439  ;;  %1085 = vmatpush.msra.mxu1 %v917_v56  ;;  %v904_v59 = vand.u32 2147483648, %v2138_v45  ;;  %vm697_vm0 = vcmp.eq.f32.partialorder %v2147_v24, inf }
 0x157   : > { %vm699_vm1 = vcmp.eq.f32.partialorder %v2147_v24, 0.0  ;;  %v681_v61 = vmul.f32 0.5, %v680_v55  ;;  %v2269_v62 = vpop.eup %1441  ;;  %v1023_v36 = vmax.f32 %v917_v56, %v1040_v15  ;;  %v710_v63 = vsel %vm709_vm12, %v2140_v17, %v708_v60  ;;  %v2283_v18 = vpop.xlane.xlu2 %586 }
 0x158   : > { %v902_v2 = vsel %vm901_vm14, %v2138_v45, %v900_v57  ;;  %v694_v10 = vsub.f32 1.5, %v693_v11  ;;  %v2277_v3 = vpop.eup %1443  ;;  %v713_v6 = vsel %vm711_vm13, %v712_v46, %v710_v63  ;;  %v883_v9 = vmul.f32 %v2221_v29, %v2173_v8 }
 0x159   : > { %v905_v44 = vsel %vm903_vm15, %v904_v59, %v902_v2  ;;  %v682_v0 = vsub.f32 1.5, %v681_v61  ;;  %v1027_v12 = vmax.f32 %v1023_v36, %v713_v6  ;;  %1066 = vmatpush.msra.mxu0 %v713_v6  ;;  %v700_v22 = vand.u32 2147483648, %v2147_v24 }
 0x15a   : > { %1086 = vmatpush.msra.mxu1 %v905_v44  ;;  %v695_v16 = vmul.f32 %v2197_v1, %v694_v10  ;;  %vm685_vm2 = vcmp.eq.f32.partialorder %v2175_v39, inf  ;;  %1445 = vrsqrt.f32 %v2262_v58  ;;  %v884_v45 = vmul.f32 %v2221_v29, %v883_v9 }
 0x15b   : > { %v683_v17 = vmul.f32 %v1436_v38, %v682_v0  ;;  %v871_v23 = vmul.f32 %v2240_v28, %v2180_v51  ;;  %1447 = vrsqrt.f32 %v2283_v18  ;;  %vm687_vm3 = vcmp.eq.f32.partialorder %v2175_v39, 0.0 }
 0x15c   : > { %v696_v14 = vmul.f32 %v695_v16, %v2147_v24  ;;  %v688_v1 = vand.u32 2147483648, %v2175_v39  ;;  %v1031_v25 = vmax.f32 %v1027_v12, %v905_v44  ;;  %v885_v52 = vmul.f32 0.5, %v884_v45 }
 0x15d   : > { %v684_v26 = vmul.f32 %v683_v17, %v2175_v39  ;;  %v872_v31 = vmul.f32 %v2240_v28, %v871_v23  ;;  %1449 = vrsqrt.f32 %v2256_v54  ;;  %vm889_vm4 = vcmp.eq.f32.partialorder %v2173_v8, inf  ;;  %v2318_v43 = vpop.xlane.xlu0 %535 }
 0x15e   : > { %v698_v32 = vsel %vm697_vm0, %v2147_v24, %v696_v14  ;;  %v667_v5 = vmul.f32 %v2269_v62, %v2213_v21  ;;  %v886_v38 = vsub.f32 1.5, %v885_v52  ;;  %v2312_v40 = vpop.xlane.xlu1 %583  ;;  %vm891_vm5 = vcmp.eq.f32.partialorder %v2173_v8, 0.0 }
 0x15f   : > { %v701_v34 = vsel %vm699_vm1, %v700_v22, %v698_v32  ;;  %v686_v35 = vsel %vm685_vm2, %v2175_v39, %v684_v26  ;;  %v873_v27 = vmul.f32 0.5, %v872_v31  ;;  %v892_v42 = vand.u32 2147483648, %v2173_v8 }
 0x160   : > { %1067 = vmatpush.msra.mxu0 %v701_v34  ;;  %v689_v41 = vsel %vm687_vm3, %v688_v1, %v686_v35  ;;  %v668_v24 = vmul.f32 %v2269_v62, %v667_v5  ;;  %v2321_v47 = vpop.eup %1445  ;;  %v1035_v7 = vmax.f32 %v1031_v25, %v701_v34  ;;  %v887_v20 = vmul.f32 %v2221_v29, %v886_v38 }
 0x161   : > { %v874_v48 = vsub.f32 1.5, %v873_v27  ;;  %vm877_vm6 = vcmp.eq.f32.partialorder %v2180_v51, inf  ;;  %v2325_v46 = vpop.eup %1447  ;;  %vm879_vm7 = vcmp.eq.f32.partialorder %v2180_v51, 0.0  ;;  %1451 = vrsqrt.f32 %v2312_v40 }
 0x162   : > { %1068 = vmatpush.msra.mxu0 %v689_v41  ;;  %v669_v39 = vmul.f32 0.5, %v668_v24  ;;  %v859_v49 = vmul.f32 %v2264_v13, %v2211_v19  ;;  %v1039_v15 = vmax.f32 %v1035_v7, %v689_v41  ;;  %v888_v30 = vmul.f32 %v887_v20, %v2173_v8 }
 0x163   : > { %v875_v33 = vmul.f32 %v2240_v28, %v874_v48  ;;  %1453 = vrsqrt.f32 %v2318_v43  ;;  %v1450_v29 = vpop.eup %1449  ;;  %v880_v50 = vand.u32 2147483648, %v2180_v51  ;;  %v655_v56 = vmul.f32 %v2277_v3, %v2232_v37 }
 0x164   : > { %v670_v53 = vsub.f32 1.5, %v669_v39  ;;  %v860_v55 = vmul.f32 %v2264_v13, %v859_v49  ;;  %v890_v60 = vsel %vm889_vm4, %v2173_v8, %v888_v30  ;;  %vm673_vm8 = vcmp.eq.f32.partialorder %v2213_v21, inf }
 0x165   : > { %v876_v57 = vmul.f32 %v875_v33, %v2180_v51  ;;  %vm675_vm9 = vcmp.eq.f32.partialorder %v2213_v21, 0.0  ;;  %v893_v28 = vsel %vm891_vm5, %v892_v42, %v890_v60  ;;  %v656_v61 = vmul.f32 %v2277_v3, %v655_v56 }
 0x166   : > { %v671_v11 = vmul.f32 %v2269_v62, %v670_v53  ;;  %v861_v59 = vmul.f32 0.5, %v860_v55  ;;  %v1014_v36 = vmax.f32 %v893_v28, %v1039_v15  ;;  %1087 = vmatpush.msra.mxu1 %v893_v28  ;;  %v676_v2 = vand.u32 2147483648, %v2213_v21 }
 0x167   : > { %v878_v63 = vsel %vm877_vm6, %v2180_v51, %v876_v57  ;;  %vm865_vm10 = vcmp.eq.f32.partialorder %v2211_v19, inf  ;;  %v2353_v10 = vpop.eup %1451  ;;  %v657_v44 = vmul.f32 0.5, %v656_v61  ;;  %vm867_vm11 = vcmp.eq.f32.partialorder %v2211_v19, 0.0 }
 0x168   : > { %v881_v8 = vsel %vm879_vm7, %v880_v50, %v878_v63  ;;  %v672_v62 = vmul.f32 %v671_v11, %v2213_v21  ;;  %v862_v6 = vsub.f32 1.5, %v861_v59  ;;  %v868_v9 = vand.u32 2147483648, %v2211_v19 }
 0x169   : > { %v1454_v0 = vpop.eup %1453  ;;  %1088 = vmatpush.msra.mxu1 %v881_v8  ;;  %vm661_vm12 = vcmp.eq.f32.partialorder %v2232_v37, inf  ;;  %v643_v12 = vmul.f32 %v1450_v29, %v2256_v54  ;;  %v1018_v16 = vmax.f32 %v1014_v36, %v881_v8  ;;  %v658_v17 = vsub.f32 1.5, %v657_v44 }
 0x16a   : > { %v674_v51 = vsel %vm673_vm8, %v2213_v21, %v672_v62  ;;  %v863_v22 = vmul.f32 %v2264_v13, %v862_v6  ;;  %v823_v45 = vmul.f32 %v2353_v10, %v2312_v40  ;;  %v847_v1 = vmul.f32 %v2321_v47, %v2262_v58 }
 0x16b   : > { %v677_v23 = vsel %vm675_vm9, %v676_v2, %v674_v51  ;;  %v644_v14 = vmul.f32 %v1450_v29, %v643_v12  ;;  %v631_v25 = vmul.f32 %v1454_v0, %v2318_v43  ;;  %v659_v31 = vmul.f32 %v2277_v3, %v658_v17 }
 0x16c   : > { %v1022_v26 = vmax.f32 %v1018_v16, %v677_v23  ;;  %1069 = vmatpush.msra.mxu0 %v677_v23  ;;  %v864_v52 = vmul.f32 %v863_v22, %v2211_v19  ;;  %vm663_vm13 = vcmp.eq.f32.partialorder %v2232_v37, 0.0  ;;  %v848_v32 = vmul.f32 %v2321_v47, %v847_v1 }
 0x16d   : > { %v645_v13 = vmul.f32 0.5, %v644_v14  ;;  %v835_v21 = vmul.f32 %v2325_v46, %v2283_v18  ;;  %v660_v34 = vmul.f32 %v659_v31, %v2232_v37  ;;  %v664_v35 = vand.u32 2147483648, %v2232_v37 }
 0x16e   : > { %v866_v5 = vsel %vm865_vm10, %v2211_v19, %v864_v52  ;;  %vm649_vm14 = vcmp.eq.f32.partialorder %v2256_v54, inf  ;;  %v849_v27 = vmul.f32 0.5, %v848_v32  ;;  %vm651_vm15 = vcmp.eq.f32.partialorder %v2256_v54, 0.0 }
 0x16f   : > { %v869_v3 = vsel %vm867_vm11, %v868_v9, %v866_v5  ;;  %v646_v38 = vsub.f32 1.5, %v645_v13  ;;  %v836_v41 = vmul.f32 %v2325_v46, %v835_v21  ;;  %v662_v24 = vsel %vm661_vm12, %v2232_v37, %v660_v34 }
 0x170   : > { %v1026_v42 = vmax.f32 %v1022_v26, %v869_v3  ;;  %1089 = vmatpush.msra.mxu1 %v869_v3  ;;  %v632_v7 = vmul.f32 %v1454_v0, %v631_v25  ;;  %v665_v20 = vsel %vm663_vm13, %v664_v35, %v662_v24  ;;  %v850_v39 = vsub.f32 1.5, %v849_v27 }
 0x171   : > { %v647_v48 = vmul.f32 %v1450_v29, %v646_v38  ;;  %v837_v19 = vmul.f32 0.5, %v836_v41  ;;  %1070 = vmatpush.msra.mxu0 %v665_v20  ;;  %v652_v49 = vand.u32 2147483648, %v2256_v54  ;;  %vm853_vm0 = vcmp.eq.f32.partialorder %v2262_v58, inf }
 0x172   : > { %vm855_vm1 = vcmp.eq.f32.partialorder %v2262_v58, 0.0  ;;  %v633_v15 = vmul.f32 0.5, %v632_v7  ;;  %v851_v33 = vmul.f32 %v2321_v47, %v850_v39  ;;  %v856_v50 = vand.u32 2147483648, %v2262_v58  ;;  %v1108_v47 = vpop.xlane.xlu2 %1107 }
 0x173   : > { %v648_v30 = vmul.f32 %v647_v48, %v2256_v54  ;;  %v838_v53 = vsub.f32 1.5, %v837_v19  ;;  %vm841_vm2 = vcmp.eq.f32.partialorder %v2283_v18, inf  ;;  %vm843_vm3 = vcmp.eq.f32.partialorder %v2283_v18, 0.0 }
 0x174   : > { %v634_v37 = vsub.f32 1.5, %v633_v15  ;;  %v824_v29 = vmul.f32 %v2353_v10, %v823_v45  ;;  %v1030_v55 = vmax.f32 %v1026_v42, %v665_v20  ;;  %v852_v60 = vmul.f32 %v851_v33, %v2262_v58 }
 0x175   : > { %v650_v56 = vsel %vm649_vm14, %v2256_v54, %v648_v30  ;;  %v839_v57 = vmul.f32 %v2325_v46, %v838_v53  ;;  %v844_v11 = vand.u32 2147483648, %v2283_v18  ;;  %vm637_vm4 = vcmp.eq.f32.partialorder %v2318_v43, inf }
 0x176   : > { %v653_v28 = vsel %vm651_vm15, %v652_v49, %v650_v56  ;;  %v635_v59 = vmul.f32 %v1454_v0, %v634_v37  ;;  %v825_v61 = vmul.f32 0.5, %v824_v29  ;;  %v854_v63 = vsel %vm853_vm0, %v2262_v58, %v852_v60 }
 0x177   : > { %v1034_v36 = vmax.f32 %v1030_v55, %v653_v28  ;;  %1071 = vmatpush.msra.mxu0 %v653_v28  ;;  %v840_v2 = vmul.f32 %v839_v57, %v2283_v18  ;;  %v857_v46 = vsel %vm855_vm1, %v856_v50, %v854_v63  ;;  %v1109_v62 = vrot.slane %v1108_v47, 4 }
 0x178   : > { %v636_v54 = vmul.f32 %v635_v59, %v2318_v43  ;;  %v826_v8 = vsub.f32 1.5, %v825_v61  ;;  %1090 = vmatpush.msra.mxu1 %v857_v46  ;;  %v640_v0 = vand.u32 2147483648, %v2318_v43  ;;  %v1053_v9 = vperm.slane %v1949_v4, 0 }
 0x179   : > { %v1038_v6 = vmax.f32 %v1034_v36, %v857_v46  ;;  %v842_v44 = vsel %vm841_vm2, %v2283_v18, %v840_v2  ;;  %vm639_vm5 = vcmp.eq.f32.partialorder %v2318_v43, 0.0  ;;  %v1110_v17 = vadd.f32 %v1109_v62, %v1108_v47  ;;  %v1455_v18 = vld [vmem:[%s396_s28] ss:$4 sm:$0x3] }
 0x17a   : > { %v845_v12 = vsel %vm843_vm3, %v844_v11, %v842_v44  ;;  %v638_v58 = vsel %vm637_vm4, %v2318_v43, %v636_v54  ;;  %v827_v16 = vmul.f32 %v2353_v10, %v826_v8  ;;  %vm829_vm6 = vcmp.eq.f32.partialorder %v2312_v40, inf }
 0x17b   : > { %v1042_v51 = vmax.f32 %v1038_v6, %v845_v12  ;;  %1091 = vmatpush.msra.mxu1 %v845_v12  ;;  %v641_v22 = vsel %vm639_vm5, %v640_v0, %v638_v58  ;;  %v832_v4 = vand.u32 2147483648, %v2312_v40  ;;  %v1054_v14 = vperm.slane %v1455_v18, 1 }
 0x17c   : > { %1072 = vmatpush.msra.mxu0 %v641_v22  ;;  %v828_v45 = vmul.f32 %v827_v16, %v2312_v40  ;;  %vm831_vm7 = vcmp.eq.f32.partialorder %v2312_v40, 0.0  ;;  %v1111_v1 = vrot.slane %v1110_v17, 2  ;;  %v1120_v41 = vstv %s1119_s7 }
 0x17d   : > { %v1043_v23 = vmax.f32 %v641_v22, %v1042_v51  ;;  %1073 = vmatmul.f32.vlgmr.msra.gmra.mxu0 %v1053_v9  ;;  %vm1122_vm8 = vcmask 0  }
 0x17e   : > { %v830_v43 = vsel %vm829_vm6, %v2312_v40, %v828_v45  ;;  %v1112_v52 = vadd.f32 %v1111_v1, %v1110_v17 }
 0x17f   : > { %v833_v10 = vsel %vm831_vm7, %v832_v4, %v830_v43 }
 0x180   : > { %v1044_v25 = vmax.f32 %v833_v10, %v1043_v23  ;;  %1092 = vmatpush.msra.mxu1 %v833_v10  ;;  %v1113_v32 = vrot.slane %v1112_v52, 1 }
 0x181   : > { %1093 = vmatmul.f32.vlgmr.msra.gmra.mxu1 %v1054_v14 }
 0x182   : > { %v1045_v26 = vrot.slane %v1044_v25, 4  ;;  %v1114_v34 = vadd.f32 %v1113_v32, %v1112_v52 }
 0x184   : > { %v1046_v31 = vmax.f32 %v1044_v25, %v1045_v26 }
 0x186   : > { %v1047_v13 = vrot.slane %v1046_v31, 2 }
 0x188   : > { %v1048_v21 = vmax.f32 %v1046_v31, %v1047_v13 }
 0x18a   : > { %v1049_v5 = vrot.slane %v1048_v21, 1 }
 0x18c   : > { %v1050_v35 = vmax.f32 %v1048_v21, %v1049_v5 }
 0x18e   : > { %1282 = vpush %v1050_v35 }
 0x18f   : > { %1284 = vpush %v1114_v34 }
 0x1bf   : > { %s1283_s6 = spop %1282 }
 0x1c0   : > { %s1285_s0 = spop %1284 }
 0x1c1   : > { %s1116_s1 = smul.f32 %s1285_s0, %s1283_s6 }
 0x1c3   : > { %v1117_v27 = vstv %s1116_s1 }
 0x1fa   : > { %v1074_v40 = vpop.f32.mrf.mxu0 }
 0x1fe   : > { %v1094_v3 = vpop.f32.mrf.mxu1 }
 0x1ff   : > { %v1095_v38 = vadd.f32 %v1094_v3, %v1074_v40 }
 0x201   : > { %v1118_v42 = vsub.f32 %v1095_v38, %v1117_v27 }
 0x203   : > { %v1121_v24 = vmul.f32 %v1120_v41, %v1118_v42 }
 0x205   : > { %1123 = vst.msk [vmem:[%s302_s9] sm:$0x1] %vm1122_vm8, %v1121_v24 }
 0x206 PF: > { %s19_s22 = sadd.s32 1, %s1635_s22   ;;  %s2488_s13 = sld [smem:[#allocation13_spill]] }
 0x207   : > { %p16_p5 = scmp.ge.s32.totalorder %s19_s22, 10   ;;  %s2489_s15 = smov %s1611_s16 }
 0x208   : > { %s2490_s16 = smov %s1615_s17  ;;  %s2491_s17 = smov %s1733_s11 }
 0x209   : > { %s2492_s18 = smov %s1627_s20  ;;  %s2493_s19 = smov %s1631_s21 }
 0x20a   : > { %s2494_s20 = smov %s2497_s23  ;;  %18 = sbr.rel (!%p16_p5) target bundleno = 11 (0xb), region = 102 }
 0x20c   : > { %s2495_s21 = smov %s2488_s13 }
 0x20f   :  { %1149 = vsyncpa [#allocation4], 1 }
 0x210   :  { %1151 = vsyncpa [#allocation4 + $0x1], 1 }
 0x211   :  { %1152 = vsyncpa [#allocation8], 1 }
 0x212   :  { %1154 = vsyncpa [#allocation8 + $0x1], 1 }
 0x213   :  { %1155 = vsyncpa [#allocation5], 1 }
 0x214   :  { %1157 = vsyncpa [#allocation5 + $0x1], 1 }

</bundles_post_ra>
